<compile_context>
chip_gen: v5e
topology: v5e:2x2
jax: 0.10.0
libtpu: 0.0.40
codegen_flags: <defaults>
</compile_context>

<pallas_src>
import numpy as np
import jax
import jax.numpy as jnp
from jax import lax
from jax.experimental import pallas as pl
from jax.experimental.pallas import tpu as pltpu


def _round_up(x, m):
    return (x + m - 1) // m * m


_ACTS = {
    "relu": jax.nn.relu,
    "tanh": jnp.tanh,
    "sigmoid": jax.nn.sigmoid,
    # PyTorch nn.GELU default is the exact erf formulation.
    "gelu": lambda v: jax.nn.gelu(v, approximate=False),
    "linear": lambda v: v,
}

# Activations that commute with the time max-pool (monotone non-decreasing).
# gelu is NOT monotone, so it must keep activate-then-pool (done per chunk).
_MONOTONE = frozenset({"relu", "tanh", "sigmoid", "linear"})

_CHUNK_TARGET_ROWS = 512   # target M rows per conv chunk (MXU fill vs. VMEM footprint)


def _vmem_capacity_bytes():
    """Per-core VMEM: 128 MiB on v5e/v6e, 64 MiB on v7x. Conservative fallback."""
    try:
        info = pltpu.get_tpu_info()
        for attr in ("vmem_capacity_bytes", "vmem_bytes", "vmem_size_bytes",
                     "vmem_capacity"):
            v = getattr(info, attr, None)
            if v:
                return int(v)
    except Exception:
        pass
    return 64 * 1024 * 1024


def _vmem_need_bytes(bt, tc, Sx, Kx, NF, U_pad, n_taps):
    x_tile = 2 * Sx * bt * Kx * 2                       # bf16 x tile, double-buffered
    weights = 2 * (n_taps * Kx * NF * 2 + NF * 4        # conv w (bf16) + conv b (f32)
                   + NF * U_pad * 2 + U_pad * 4)        # dense w (bf16) + dense b (f32)
    scratch = tc * bt * NF * 4 + bt * NF * 4 + bt * NF * 2
    out_tile = 2 * bt * U_pad * 4
    return x_tile + weights + scratch + out_tile


def _pick_batch_tile(B, T_out, Sx, Kx, NF, U_pad, n_taps, budget):
    b_cap = _round_up(B, 16)
    for bt in (512, 256, 128, 64, 32, 16):
        if bt > b_cap:
            continue
        tc = max(1, min(T_out, _CHUNK_TARGET_ROWS // bt))
        if _vmem_need_bytes(bt, tc, Sx, Kx, NF, U_pad, n_taps) <= budget:
            return bt
    return 16


def _max_over_row_blocks(v, nblk, Bt):
    """v: (nblk*Bt, F) with row = t*Bt + b  ->  (Bt, F) max over t (static tree)."""
    parts = [v[t * Bt:(t + 1) * Bt, :] for t in range(nblk)]
    while len(parts) > 1:
        nxt = []
        for j in range(0, len(parts) - 1, 2):
            nxt.append(jnp.maximum(parts[j], parts[j + 1]))
        if len(parts) % 2:
            nxt.append(parts[-1])
        parts = nxt
    return parts[0]


def _make_textcnn_kernel(*, kernel_sizes, activations, act, S, Bt, F_pad,
                         n_taps, Tc, T_out):
    """Kernel for one batch tile.

    Refs:
      x_ref    : (Sx*Bt, Kx)        bf16, row = t*Bt + b_local (time-major)
      wconv_ref: (n_taps, Kx, NF)   bf16, all branches stacked along N per tap
      bconv_ref: (1, NF)            f32
      wd_ref   : (NF, U_pad)        bf16 (dense, branch-major row order)
      bd_ref   : (1, U_pad)         f32
      out_ref  : (Bt, U_pad)        f32
      cacc_ref : (Tc*Bt, NF)        f32 scratch, per-chunk conv accumulator
      macc_ref : (Bt, NF)           f32 scratch, running time-max
      feats_ref: (Bt, NF)           bf16 scratch, pooled features for the dense
    """

    def kernel(x_ref, wconv_ref, bconv_ref, wd_ref, bd_ref, out_ref,
               cacc_ref, macc_ref, feats_ref):
        # ---- chunked conv + running time-max pool -----------------------------
        for c0 in range(0, T_out, Tc):          # static chunk loop
            tc = min(Tc, T_out - c0)
            rows = tc * Bt
            # Tap sum accumulated in-place: one MXU matmul per tap with all
            # branches stacked along N (n_k*F_pad wide).
            for dt in range(n_taps):
                xs = x_ref[(c0 + dt) * Bt:(c0 + dt + tc) * Bt, :]
                part = jnp.dot(xs, wconv_ref[dt],
                               preferred_element_type=jnp.float32)
                if dt == 0:
                    cacc_ref[0:rows, :] = part
                else:
                    cacc_ref[0:rows, :] += part
            # Fold this chunk into the running max, branch by branch, each branch
            # restricted to its statically-known valid time blocks (t < T_i).
            for i, k in enumerate(kernel_sizes):
                T_i = S - k + 1
                v = min(tc, T_i - c0)
                if v <= 0:
                    continue
                lo, hi = i * F_pad, (i + 1) * F_pad
                blk = cacc_ref[0:v * Bt, lo:hi]
                if activations[i] not in _MONOTONE:
                    # non-monotone (e.g. gelu): must activate before pooling.
                    blk = _ACTS[activations[i]](blk + bconv_ref[:, lo:hi])
                cm = _max_over_row_blocks(blk, v, Bt)
                if c0 == 0:
                    macc_ref[:, lo:hi] = cm
                else:
                    macc_ref[:, lo:hi] = jnp.maximum(macc_ref[:, lo:hi], cm)

        # ---- finalize pooled features (bias+activation on the small tile) ------
        # Padded F lanes hold act(0 + 0); they are cancelled by the exactly-zero
        # padded rows of the dense weight built in the wrapper.
        for i, _k in enumerate(kernel_sizes):
            lo, hi = i * F_pad, (i + 1) * F_pad
            p = macc_ref[:, lo:hi]
            if activations[i] in _MONOTONE:
                p = _ACTS[activations[i]](p + bconv_ref[:, lo:hi])
            feats_ref[:, lo:hi] = p.astype(jnp.bfloat16)

        # ---- fused dense over all branches -------------------------------------
        dense = jnp.dot(feats_ref[...], wd_ref[...],
                        preferred_element_type=jnp.float32)
        out_ref[...] = _ACTS[act](dense + bd_ref[...])

    return kernel


def text_cnn_forward(x, params, *, kernel_sizes, activations, act, units,
                     batch_tile=None):
    """x: (B, seq_len, embedding_size) float32 -> (B, units) float32."""
    B, S, E = x.shape
    n_k = len(kernel_sizes)
    F = params["conv_w"][0].shape[0]
    k_max = max(kernel_sizes)
    k_min = min(kernel_sizes)
    assert S >= k_max, "seq_len must be >= max kernel size (valid padding)"
    T_out = S - k_min + 1

    E_pad = _round_up(E, 128)
    F_pad = _round_up(F, 128)
    U_pad = _round_up(units, 128)
    NF = n_k * F_pad

    # In-lane im2col: if all k_max taps fit inside one padded 128-lane K block,
    # pack them into the lanes that would otherwise be zero padding of E.
    im2col = (k_max * E <= E_pad)
    if im2col:
        n_taps = 1
        Sx = T_out                    # row block t already carries taps t..t+k_max-1
    else:
        n_taps = k_max
        Sx = S + (k_max - k_min)      # zero time blocks keep shared tap windows in-bounds
    Kx = E_pad

    # ---- per-generation tile sizing -------------------------------------------
    cap = _vmem_capacity_bytes()
    budget = min((cap * 3) // 4, 112 * 1024 * 1024)

    if batch_tile is None:
        Bt = _pick_batch_tile(B, T_out, Sx, Kx, NF, U_pad, n_taps, budget)
    else:
        Bt = max(16, _round_up(batch_tile, 16))
    Bt = max(16, min(Bt, _round_up(B, 16)))
    # Prefer >= 2 grid steps when the batch allows it, so the "parallel" batch axis
    # actually shards across v7x's two TensorCores.
    while (Bt >= 32 and (Bt // 2) % 16 == 0
           and _round_up(B, Bt) // Bt < 2
           and _round_up(B, Bt // 2) // (Bt // 2) >= 2):
        Bt //= 2
    B_pad = _round_up(B, Bt)
    G = B_pad // Bt
    Tc = max(1, min(T_out, _CHUNK_TARGET_ROWS // Bt))

    # ---- x layout: batch-tiled, time-major 2D slab (G*Sx*Bt, Kx) bf16 ----------
    x_bf = x.astype(jnp.bfloat16)
    if im2col:
        xt = jnp.zeros((B, T_out + k_max - 1, E), jnp.bfloat16).at[:, :S, :].set(x_bf)
        xcat = jnp.zeros((B_pad, Sx, E_pad), jnp.bfloat16)
        for dt in range(k_max):
            xcat = xcat.at[:B, :, dt * E:(dt + 1) * E].set(xt[:, dt:dt + T_out, :])
    else:
        xcat = jnp.zeros((B_pad, Sx, E_pad), jnp.bfloat16).at[:B, :S, :E].set(x_bf)
    # global row = g*Sx*Bt + t*Bt + b_local
    xg = xcat.reshape(G, Bt, Sx, E_pad).transpose(0, 2, 1, 3).reshape(G * Sx * Bt, E_pad)

    # ---- conv weights: per tap, all branches stacked along N -------------------
    w_taps = []
    for dt in range(n_taps):
        wt = jnp.zeros((Kx, NF), jnp.float32)
        for i, k in enumerate(kernel_sizes):
            wi = params["conv_w"][i][:, 0]                       # (F, k, E)
            if im2col:
                for d in range(k):
                    wt = wt.at[d * E:(d + 1) * E,
                               i * F_pad:i * F_pad + F].set(wi[:, d, :].T)
            elif dt < k:
                wt = wt.at[:E, i * F_pad:i * F_pad + F].set(wi[:, dt, :].T)
        w_taps.append(wt)
    wconv = jnp.stack(w_taps, axis=0).astype(jnp.bfloat16)       # (n_taps, Kx, NF)

    bconv = jnp.zeros((1, NF), jnp.float32)
    for i in range(n_k):
        bconv = bconv.at[0, i * F_pad:i * F_pad + F].set(params["conv_b"][i])

    # ---- dense: PyTorch flatten index f*n_k + i -> branch-major row i*F_pad + f --
    # Padded rows/cols stay exactly zero: this cancels act(0+0) in padded F lanes.
    dw = params["dense_w"].reshape(units, F, n_k).transpose(2, 1, 0)  # (n_k, F, units)
    wd = jnp.zeros((n_k, F_pad, U_pad), jnp.float32).at[:, :F, :units].set(dw)
    wd = wd.reshape(NF, U_pad).astype(jnp.bfloat16)
    bd = jnp.zeros((1, U_pad), jnp.float32).at[0, :units].set(params["dense_b"])

    kernel = _make_textcnn_kernel(
        kernel_sizes=tuple(kernel_sizes), activations=tuple(activations), act=act,
        S=S, Bt=Bt, F_pad=F_pad, n_taps=n_taps, Tc=Tc, T_out=T_out)

    out = pl.pallas_call(
        kernel,
        out_shape=jax.ShapeDtypeStruct((B_pad, U_pad), jnp.float32),
        grid=(G,),
        in_specs=[
            pl.BlockSpec((Sx * Bt, Kx), lambda g: (g, 0)),         # x tile (pipelined)
            pl.BlockSpec((n_taps, Kx, NF), lambda g: (0, 0, 0)),   # conv weights (resident)
            pl.BlockSpec((1, NF), lambda g: (0, 0)),               # conv bias
            pl.BlockSpec((NF, U_pad), lambda g: (0, 0)),           # dense weight
            pl.BlockSpec((1, U_pad), lambda g: (0, 0)),            # dense bias
        ],
        out_specs=pl.BlockSpec((Bt, U_pad), lambda g: (g, 0)),
        scratch_shapes=[
            pltpu.VMEM((Tc * Bt, NF), jnp.float32),   # chunk conv accumulator
            pltpu.VMEM((Bt, NF), jnp.float32),        # running time-max
            pltpu.VMEM((Bt, NF), jnp.bfloat16),       # pooled features for the dense
        ],
        compiler_params=pltpu.CompilerParams(
            dimension_semantics=("parallel",),        # shard batch tiles over v7x's 2 TCs
            vmem_limit_bytes=int(budget),             # 96 MiB on v5e/v6e, 48 MiB on v7x
        ),
    )(xg, wconv, bconv, wd, bd)

    return out[:B, :units]


def text_cnn_reference(x, params, *, kernel_sizes, activations, act):
    """Independent pure-JAX (f32) reference mirroring the PyTorch NCHW module."""
    B, S, E = x.shape
    x_nchw = x[:, None, :, :]                                        # (B,1,S,E)
    pools = []
    for i, k in enumerate(kernel_sizes):
        conv = lax.conv_general_dilated(
            x_nchw, params["conv_w"][i], window_strides=(1, 1), padding="VALID",
            dimension_numbers=("NCHW", "OIHW", "NCHW"),
            precision=lax.Precision.HIGHEST)                         # (B,F,T,1)
        conv = conv + params["conv_b"][i][None, :, None, None]
        a = _ACTS[activations[i]](conv)
        pools.append(jnp.max(a, axis=2, keepdims=True))              # (B,F,1,1)
    out = jnp.concatenate(pools, axis=-1)                            # (B,F,1,n_k)
    out = out.reshape(B, -1)                                         # Flatten (f*n_k+i)
    out = out @ params["dense_w"].T + params["dense_b"]              # Linear
    return _ACTS[act](out)


if __name__ == "__main__":
    def run_case(B, S, E, F, units, kernel_sizes, activations, act):
        n_k = len(kernel_sizes)
        key = jax.random.PRNGKey(0)
        keys = jax.random.split(key, 2 * n_k + 3)
        conv_w = [0.1 * jax.random.normal(keys[2 * i], (F, 1, k, E), jnp.float32)
                  for i, k in enumerate(kernel_sizes)]
        conv_b = [0.1 * jax.random.normal(keys[2 * i + 1], (F,), jnp.float32)
                  for i in range(n_k)]
        dense_w = 0.1 * jax.random.normal(keys[2 * n_k], (units, n_k * F), jnp.float32)
        dense_b = 0.1 * jax.random.normal(keys[2 * n_k + 1], (units,), jnp.float32)
        x = jax.random.normal(keys[2 * n_k + 2], (B, S, E), jnp.float32)
        params = {"conv_w": conv_w, "conv_b": conv_b,
                  "dense_w": dense_w, "dense_b": dense_b}

        out = jax.block_until_ready(
            text_cnn_forward(x, params, kernel_sizes=kernel_sizes,
                             activations=activations, act=act, units=units))
        ref = jax.block_until_ready(
            text_cnn_reference(x, params, kernel_sizes=kernel_sizes,
                               activations=activations, act=act))
        assert out.shape == (B, units)
        # bf16 MXU operands (f32 accumulation) vs f32/HIGHEST reference -> relaxed tol.
        np.testing.assert_allclose(np.asarray(out), np.asarray(ref),
                                   atol=4e-2, rtol=4e-2)

    # Case 1: k_max*E == 128 -> in-lane im2col path (one MXU matmul per chunk).
    run_case(B=2, S=16, E=32, F=8, units=16,
             kernel_sizes=[2, 3, 4], activations=["relu", "tanh", "sigmoid"], act="tanh")
    # Case 2: k_max*E > 128 -> shared-tap-window path (k_max matmuls per chunk).
    run_case(B=3, S=12, E=48, F=8, units=16,
             kernel_sizes=[1, 3], activations=["sigmoid", "relu"], act="linear")

    print("KERNEL_OK")
</pallas_src>

<mosaic_0001>
module attributes {stable_mosaic.version = 11 : i64} {
  func.func @kernel(%arg0: i32, %arg1: memref<240x128xbf16, #tpu.memory_space<vmem>>, %arg2: memref<1x128x384xbf16, #tpu.memory_space<vmem>>, %arg3: memref<1x384xf32, #tpu.memory_space<vmem>>, %arg4: memref<384x128xbf16, #tpu.memory_space<vmem>>, %arg5: memref<1x128xf32, #tpu.memory_space<vmem>>, %arg6: memref<16x128xf32, #tpu.memory_space<vmem>>, %arg7: memref<240x384xf32, #tpu.memory_space<vmem>>, %arg8: memref<16x384xf32, #tpu.memory_space<vmem>>, %arg9: memref<16x384xbf16, #tpu.memory_space<vmem>>) attributes {dimension_semantics = [#tpu.dimension_semantics<parallel>], iteration_bounds = array<i64: 1>, scalar_prefetch = 0 : i64, scratch_operands = 3 : i64, tpu.core_type = #tpu.core_type<tc>, window_params = [{transform_indices = @transform_0, window_bounds = array<i64: 240, 128>}, {pipeline_mode = #tpu.pipeline_mode<synchronous>, transform_indices = @transform_1, window_bounds = array<i64: 1, 128, 384>}, {pipeline_mode = #tpu.pipeline_mode<synchronous>, transform_indices = @transform_2, window_bounds = array<i64: 1, 384>}, {pipeline_mode = #tpu.pipeline_mode<synchronous>, transform_indices = @transform_3, window_bounds = array<i64: 384, 128>}, {pipeline_mode = #tpu.pipeline_mode<synchronous>, transform_indices = @transform_4, window_bounds = array<i64: 1, 128>}, {transform_indices = @transform_5, window_bounds = array<i64: 16, 128>}]} {
    %c0 = arith.constant 0 : index
    %c0_0 = arith.constant 0 : index
    %0 = vector.load %arg1[%c0, %c0_0] : memref<240x128xbf16, #tpu.memory_space<vmem>>, vector<240x128xbf16>
    %c0_1 = arith.constant 0 : index
    %c0_2 = arith.constant 0 : index
    %c0_3 = arith.constant 0 : index
    %1 = vector.load %arg2[%c0_1, %c0_2, %c0_3] : memref<1x128x384xbf16, #tpu.memory_space<vmem>>, vector<1x128x384xbf16>
    %2 = vector.shape_cast %1 : vector<1x128x384xbf16> to vector<128x384xbf16>
    %cst = arith.constant dense<0.000000e+00> : vector<240x384xf32>
    %3 = tpu.matmul %0, %2, %cst {dimension_numbers = #tpu.dot_dimension_numbers<[1], [0], [0], [1], [0, 0, 1, 1], [], []>} : vector<240x128xbf16>, vector<128x384xbf16>, vector<240x384xf32> -> vector<240x384xf32>
    %c0_4 = arith.constant 0 : index
    %c0_5 = arith.constant 0 : index
    %4 = vector.load %arg7[%c0_4, %c0_5] : memref<240x384xf32, #tpu.memory_space<vmem>>, vector<240x384xf32>
    tpu.vector_store %arg7[%c0_4, %c0_5], %3 {strides = array<i32>} : memref<240x384xf32, #tpu.memory_space<vmem>>, vector<240x384xf32>,
    %c0_6 = arith.constant 0 : index
    %c0_7 = arith.constant 0 : index
    %5 = vector.load %arg7[%c0_6, %c0_7] : memref<240x384xf32, #tpu.memory_space<vmem>>, vector<240x128xf32>
    %6 = vector.extract_strided_slice %5 {offsets = [0, 0], sizes = [16, 128], strides = [1, 1]} : vector<240x128xf32> to vector<16x128xf32>
    %7 = vector.extract_strided_slice %5 {offsets = [16, 0], sizes = [16, 128], strides = [1, 1]} : vector<240x128xf32> to vector<16x128xf32>
    %8 = vector.extract_strided_slice %5 {offsets = [32, 0], sizes = [16, 128], strides = [1, 1]} : vector<240x128xf32> to vector<16x128xf32>
    %9 = vector.extract_strided_slice %5 {offsets = [48, 0], sizes = [16, 128], strides = [1, 1]} : vector<240x128xf32> to vector<16x128xf32>
    %10 = vector.extract_strided_slice %5 {offsets = [64, 0], sizes = [16, 128], strides = [1, 1]} : vector<240x128xf32> to vector<16x128xf32>
    %11 = vector.extract_strided_slice %5 {offsets = [80, 0], sizes = [16, 128], strides = [1, 1]} : vector<240x128xf32> to vector<16x128xf32>
    %12 = vector.extract_strided_slice %5 {offsets = [96, 0], sizes = [16, 128], strides = [1, 1]} : vector<240x128xf32> to vector<16x128xf32>
    %13 = vector.extract_strided_slice %5 {offsets = [112, 0], sizes = [16, 128], strides = [1, 1]} : vector<240x128xf32> to vector<16x128xf32>
    %14 = vector.extract_strided_slice %5 {offsets = [128, 0], sizes = [16, 128], strides = [1, 1]} : vector<240x128xf32> to vector<16x128xf32>
    %15 = vector.extract_strided_slice %5 {offsets = [144, 0], sizes = [16, 128], strides = [1, 1]} : vector<240x128xf32> to vector<16x128xf32>
    %16 = vector.extract_strided_slice %5 {offsets = [160, 0], sizes = [16, 128], strides = [1, 1]} : vector<240x128xf32> to vector<16x128xf32>
    %17 = vector.extract_strided_slice %5 {offsets = [176, 0], sizes = [16, 128], strides = [1, 1]} : vector<240x128xf32> to vector<16x128xf32>
    %18 = vector.extract_strided_slice %5 {offsets = [192, 0], sizes = [16, 128], strides = [1, 1]} : vector<240x128xf32> to vector<16x128xf32>
    %19 = vector.extract_strided_slice %5 {offsets = [208, 0], sizes = [16, 128], strides = [1, 1]} : vector<240x128xf32> to vector<16x128xf32>
    %20 = vector.extract_strided_slice %5 {offsets = [224, 0], sizes = [16, 128], strides = [1, 1]} : vector<240x128xf32> to vector<16x128xf32>
    %21 = arith.maximumf %6, %7 : vector<16x128xf32>
    %22 = arith.maximumf %8, %9 : vector<16x128xf32>
    %23 = arith.maximumf %10, %11 : vector<16x128xf32>
    %24 = arith.maximumf %12, %13 : vector<16x128xf32>
    %25 = arith.maximumf %14, %15 : vector<16x128xf32>
    %26 = arith.maximumf %16, %17 : vector<16x128xf32>
    %27 = arith.maximumf %18, %19 : vector<16x128xf32>
    %28 = arith.maximumf %21, %22 : vector<16x128xf32>
    %29 = arith.maximumf %23, %24 : vector<16x128xf32>
    %30 = arith.maximumf %25, %26 : vector<16x128xf32>
    %31 = arith.maximumf %27, %20 : vector<16x128xf32>
    %32 = arith.maximumf %28, %29 : vector<16x128xf32>
    %33 = arith.maximumf %30, %31 : vector<16x128xf32>
    %34 = arith.maximumf %32, %33 : vector<16x128xf32>
    %c0_8 = arith.constant 0 : index
    %c0_9 = arith.constant 0 : index
    %35 = vector.load %arg8[%c0_8, %c0_9] : memref<16x384xf32, #tpu.memory_space<vmem>>, vector<16x128xf32>
    tpu.vector_store %arg8[%c0_8, %c0_9], %34 {strides = array<i32>} : memref<16x384xf32, #tpu.memory_space<vmem>>, vector<16x128xf32>,
    %c0_10 = arith.constant 0 : index
    %c128 = arith.constant 128 : index
    %36 = vector.load %arg7[%c0_10, %c128] : memref<240x384xf32, #tpu.memory_space<vmem>>, vector<224x128xf32>
    %37 = vector.extract_strided_slice %36 {offsets = [0, 0], sizes = [16, 128], strides = [1, 1]} : vector<224x128xf32> to vector<16x128xf32>
    %38 = vector.extract_strided_slice %36 {offsets = [16, 0], sizes = [16, 128], strides = [1, 1]} : vector<224x128xf32> to vector<16x128xf32>
    %39 = vector.extract_strided_slice %36 {offsets = [32, 0], sizes = [16, 128], strides = [1, 1]} : vector<224x128xf32> to vector<16x128xf32>
    %40 = vector.extract_strided_slice %36 {offsets = [48, 0], sizes = [16, 128], strides = [1, 1]} : vector<224x128xf32> to vector<16x128xf32>
    %41 = vector.extract_strided_slice %36 {offsets = [64, 0], sizes = [16, 128], strides = [1, 1]} : vector<224x128xf32> to vector<16x128xf32>
    %42 = vector.extract_strided_slice %36 {offsets = [80, 0], sizes = [16, 128], strides = [1, 1]} : vector<224x128xf32> to vector<16x128xf32>
    %43 = vector.extract_strided_slice %36 {offsets = [96, 0], sizes = [16, 128], strides = [1, 1]} : vector<224x128xf32> to vector<16x128xf32>
    %44 = vector.extract_strided_slice %36 {offsets = [112, 0], sizes = [16, 128], strides = [1, 1]} : vector<224x128xf32> to vector<16x128xf32>
    %45 = vector.extract_strided_slice %36 {offsets = [128, 0], sizes = [16, 128], strides = [1, 1]} : vector<224x128xf32> to vector<16x128xf32>
    %46 = vector.extract_strided_slice %36 {offsets = [144, 0], sizes = [16, 128], strides = [1, 1]} : vector<224x128xf32> to vector<16x128xf32>
    %47 = vector.extract_strided_slice %36 {offsets = [160, 0], sizes = [16, 128], strides = [1, 1]} : vector<224x128xf32> to vector<16x128xf32>
    %48 = vector.extract_strided_slice %36 {offsets = [176, 0], sizes = [16, 128], strides = [1, 1]} : vector<224x128xf32> to vector<16x128xf32>
    %49 = vector.extract_strided_slice %36 {offsets = [192, 0], sizes = [16, 128], strides = [1, 1]} : vector<224x128xf32> to vector<16x128xf32>
    %50 = vector.extract_strided_slice %36 {offsets = [208, 0], sizes = [16, 128], strides = [1, 1]} : vector<224x128xf32> to vector<16x128xf32>
    %51 = arith.maximumf %37, %38 : vector<16x128xf32>
    %52 = arith.maximumf %39, %40 : vector<16x128xf32>
    %53 = arith.maximumf %41, %42 : vector<16x128xf32>
    %54 = arith.maximumf %43, %44 : vector<16x128xf32>
    %55 = arith.maximumf %45, %46 : vector<16x128xf32>
    %56 = arith.maximumf %47, %48 : vector<16x128xf32>
    %57 = arith.maximumf %49, %50 : vector<16x128xf32>
    %58 = arith.maximumf %51, %52 : vector<16x128xf32>
    %59 = arith.maximumf %53, %54 : vector<16x128xf32>
    %60 = arith.maximumf %55, %56 : vector<16x128xf32>
    %61 = arith.maximumf %58, %59 : vector<16x128xf32>
    %62 = arith.maximumf %60, %57 : vector<16x128xf32>
    %63 = arith.maximumf %61, %62 : vector<16x128xf32>
    %c0_11 = arith.constant 0 : index
    %c128_12 = arith.constant 128 : index
    %64 = vector.load %arg8[%c0_11, %c128_12] : memref<16x384xf32, #tpu.memory_space<vmem>>, vector<16x128xf32>
    tpu.vector_store %arg8[%c0_11, %c128_12], %63 {strides = array<i32>} : memref<16x384xf32, #tpu.memory_space<vmem>>, vector<16x128xf32>,
    %c0_13 = arith.constant 0 : index
    %c256 = arith.constant 256 : index
    %65 = vector.load %arg7[%c0_13, %c256] : memref<240x384xf32, #tpu.memory_space<vmem>>, vector<208x128xf32>
    %66 = vector.extract_strided_slice %65 {offsets = [0, 0], sizes = [16, 128], strides = [1, 1]} : vector<208x128xf32> to vector<16x128xf32>
    %67 = vector.extract_strided_slice %65 {offsets = [16, 0], sizes = [16, 128], strides = [1, 1]} : vector<208x128xf32> to vector<16x128xf32>
    %68 = vector.extract_strided_slice %65 {offsets = [32, 0], sizes = [16, 128], strides = [1, 1]} : vector<208x128xf32> to vector<16x128xf32>
    %69 = vector.extract_strided_slice %65 {offsets = [48, 0], sizes = [16, 128], strides = [1, 1]} : vector<208x128xf32> to vector<16x128xf32>
    %70 = vector.extract_strided_slice %65 {offsets = [64, 0], sizes = [16, 128], strides = [1, 1]} : vector<208x128xf32> to vector<16x128xf32>
    %71 = vector.extract_strided_slice %65 {offsets = [80, 0], sizes = [16, 128], strides = [1, 1]} : vector<208x128xf32> to vector<16x128xf32>
    %72 = vector.extract_strided_slice %65 {offsets = [96, 0], sizes = [16, 128], strides = [1, 1]} : vector<208x128xf32> to vector<16x128xf32>
    %73 = vector.extract_strided_slice %65 {offsets = [112, 0], sizes = [16, 128], strides = [1, 1]} : vector<208x128xf32> to vector<16x128xf32>
    %74 = vector.extract_strided_slice %65 {offsets = [128, 0], sizes = [16, 128], strides = [1, 1]} : vector<208x128xf32> to vector<16x128xf32>
    %75 = vector.extract_strided_slice %65 {offsets = [144, 0], sizes = [16, 128], strides = [1, 1]} : vector<208x128xf32> to vector<16x128xf32>
    %76 = vector.extract_strided_slice %65 {offsets = [160, 0], sizes = [16, 128], strides = [1, 1]} : vector<208x128xf32> to vector<16x128xf32>
    %77 = vector.extract_strided_slice %65 {offsets = [176, 0], sizes = [16, 128], strides = [1, 1]} : vector<208x128xf32> to vector<16x128xf32>
    %78 = vector.extract_strided_slice %65 {offsets = [192, 0], sizes = [16, 128], strides = [1, 1]} : vector<208x128xf32> to vector<16x128xf32>
    %79 = arith.maximumf %66, %67 : vector<16x128xf32>
    %80 = arith.maximumf %68, %69 : vector<16x128xf32>
    %81 = arith.maximumf %70, %71 : vector<16x128xf32>
    %82 = arith.maximumf %72, %73 : vector<16x128xf32>
    %83 = arith.maximumf %74, %75 : vector<16x128xf32>
    %84 = arith.maximumf %76, %77 : vector<16x128xf32>
    %85 = arith.maximumf %79, %80 : vector<16x128xf32>
    %86 = arith.maximumf %81, %82 : vector<16x128xf32>
    %87 = arith.maximumf %83, %84 : vector<16x128xf32>
    %88 = arith.maximumf %85, %86 : vector<16x128xf32>
    %89 = arith.maximumf %87, %78 : vector<16x128xf32>
    %90 = arith.maximumf %88, %89 : vector<16x128xf32>
    %c0_14 = arith.constant 0 : index
    %c256_15 = arith.constant 256 : index
    %91 = vector.load %arg8[%c0_14, %c256_15] : memref<16x384xf32, #tpu.memory_space<vmem>>, vector<16x128xf32>
    tpu.vector_store %arg8[%c0_14, %c256_15], %90 {strides = array<i32>} : memref<16x384xf32, #tpu.memory_space<vmem>>, vector<16x128xf32>,
    %c0_16 = arith.constant 0 : index
    %c0_17 = arith.constant 0 : index
    %92 = vector.load %arg8[%c0_16, %c0_17] : memref<16x384xf32, #tpu.memory_space<vmem>>, vector<16x128xf32>
    %c0_18 = arith.constant 0 : index
    %c0_19 = arith.constant 0 : index
    %93 = vector.load %arg3[%c0_18, %c0_19] : memref<1x384xf32, #tpu.memory_space<vmem>>, vector<1x128xf32>
    %94 = vector.broadcast %93 : vector<1x128xf32> to vector<16x128xf32>
    %95 = arith.addf %92, %94 : vector<16x128xf32>
    %cst_20 = arith.constant 0.000000e+00 : f32
    %96 = vector.broadcast %cst_20 : f32 to vector<16x128xf32>
    %97 = arith.maximumf %95, %96 : vector<16x128xf32>
    %98 = arith.truncf %97 : vector<16x128xf32> to vector<16x128xbf16>
    %c0_21 = arith.constant 0 : index
    %c0_22 = arith.constant 0 : index
    %99 = vector.load %arg9[%c0_21, %c0_22] : memref<16x384xbf16, #tpu.memory_space<vmem>>, vector<16x128xbf16>
    tpu.vector_store %arg9[%c0_21, %c0_22], %98 {strides = array<i32>} : memref<16x384xbf16, #tpu.memory_space<vmem>>, vector<16x128xbf16>,
    %c0_23 = arith.constant 0 : index
    %c128_24 = arith.constant 128 : index
    %100 = vector.load %arg8[%c0_23, %c128_24] : memref<16x384xf32, #tpu.memory_space<vmem>>, vector<16x128xf32>
    %c0_25 = arith.constant 0 : index
    %c128_26 = arith.constant 128 : index
    %101 = vector.load %arg3[%c0_25, %c128_26] : memref<1x384xf32, #tpu.memory_space<vmem>>, vector<1x128xf32>
    %102 = vector.broadcast %101 : vector<1x128xf32> to vector<16x128xf32>
    %103 = arith.addf %100, %102 : vector<16x128xf32>
    %104 = math.tanh %103 : vector<16x128xf32>
    %105 = arith.truncf %104 : vector<16x128xf32> to vector<16x128xbf16>
    %c0_27 = arith.constant 0 : index
    %c128_28 = arith.constant 128 : index
    %106 = vector.load %arg9[%c0_27, %c128_28] : memref<16x384xbf16, #tpu.memory_space<vmem>>, vector<16x128xbf16>
    tpu.vector_store %arg9[%c0_27, %c128_28], %105 {strides = array<i32>} : memref<16x384xbf16, #tpu.memory_space<vmem>>, vector<16x128xbf16>,
    %c0_29 = arith.constant 0 : index
    %c256_30 = arith.constant 256 : index
    %107 = vector.load %arg8[%c0_29, %c256_30] : memref<16x384xf32, #tpu.memory_space<vmem>>, vector<16x128xf32>
    %c0_31 = arith.constant 0 : index
    %c256_32 = arith.constant 256 : index
    %108 = vector.load %arg3[%c0_31, %c256_32] : memref<1x384xf32, #tpu.memory_space<vmem>>, vector<1x128xf32>
    %109 = vector.broadcast %108 : vector<1x128xf32> to vector<16x128xf32>
    %110 = arith.addf %107, %109 : vector<16x128xf32>
    %111 = arith.negf %110 : vector<16x128xf32>
    %112 = math.exp %111 : vector<16x128xf32>
    %cst_33 = arith.constant 1.000000e+00 : f32
    %113 = vector.broadcast %cst_33 : f32 to vector<16x128xf32>
    %114 = arith.addf %113, %112 : vector<16x128xf32>
    %115 = arith.divf %113, %114 : vector<16x128xf32>
    %116 = arith.truncf %115 : vector<16x128xf32> to vector<16x128xbf16>
    %c0_34 = arith.constant 0 : index
    %c256_35 = arith.constant 256 : index
    %117 = vector.load %arg9[%c0_34, %c256_35] : memref<16x384xbf16, #tpu.memory_space<vmem>>, vector<16x128xbf16>
    tpu.vector_store %arg9[%c0_34, %c256_35], %116 {strides = array<i32>} : memref<16x384xbf16, #tpu.memory_space<vmem>>, vector<16x128xbf16>,
    %c0_36 = arith.constant 0 : index
    %c0_37 = arith.constant 0 : index
    %118 = vector.load %arg9[%c0_36, %c0_37] : memref<16x384xbf16, #tpu.memory_space<vmem>>, vector<16x384xbf16>
    %c0_38 = arith.constant 0 : index
    %c0_39 = arith.constant 0 : index
    %119 = vector.load %arg4[%c0_38, %c0_39] : memref<384x128xbf16, #tpu.memory_space<vmem>>, vector<384x128xbf16>
    %cst_40 = arith.constant dense<0.000000e+00> : vector<16x128xf32>
    %120 = tpu.matmul %118, %119, %cst_40 {dimension_numbers = #tpu.dot_dimension_numbers<[1], [0], [0], [1], [0, 0, 1, 1], [], []>} : vector<16x384xbf16>, vector<384x128xbf16>, vector<16x128xf32> -> vector<16x128xf32>
    %c0_41 = arith.constant 0 : index
    %c0_42 = arith.constant 0 : index
    %121 = vector.load %arg5[%c0_41, %c0_42] : memref<1x128xf32, #tpu.memory_space<vmem>>, vector<1x128xf32>
    %122 = vector.broadcast %121 : vector<1x128xf32> to vector<16x128xf32>
    %123 = arith.addf %120, %122 : vector<16x128xf32>
    %124 = math.tanh %123 : vector<16x128xf32>
    %c0_43 = arith.constant 0 : index
    %c0_44 = arith.constant 0 : index
    %125 = vector.load %arg6[%c0_43, %c0_44] : memref<16x128xf32, #tpu.memory_space<vmem>>, vector<16x128xf32>
    tpu.vector_store %arg6[%c0_43, %c0_44], %124 {strides = array<i32>} : memref<16x128xf32, #tpu.memory_space<vmem>>, vector<16x128xf32>,
    return
  }
  func.func @transform_0(%arg0: i32) -> (i32, i32) {
    %c0_i32 = arith.constant 0 : i32
    %c0_i32_0 = arith.constant 0 : i32
    return %arg0, %c0_i32 : i32, i32
  }
  func.func @transform_1(%arg0: i32) -> (i32, i32, i32) {
    %c0_i32 = arith.constant 0 : i32
    %c0_i32_0 = arith.constant 0 : i32
    %c0_i32_1 = arith.constant 0 : i32
    %c0_i32_2 = arith.constant 0 : i32
    return %c0_i32, %c0_i32_0, %c0_i32_1 : i32, i32, i32
  }
  func.func @transform_2(%arg0: i32) -> (i32, i32) {
    %c0_i32 = arith.constant 0 : i32
    %c0_i32_0 = arith.constant 0 : i32
    %c0_i32_1 = arith.constant 0 : i32
    return %c0_i32, %c0_i32_0 : i32, i32
  }
  func.func @transform_3(%arg0: i32) -> (i32, i32) {
    %c0_i32 = arith.constant 0 : i32
    %c0_i32_0 = arith.constant 0 : i32
    %c0_i32_1 = arith.constant 0 : i32
    return %c0_i32, %c0_i32_0 : i32, i32
  }
  func.func @transform_4(%arg0: i32) -> (i32, i32) {
    %c0_i32 = arith.constant 0 : i32
    %c0_i32_0 = arith.constant 0 : i32
    %c0_i32_1 = arith.constant 0 : i32
    return %c0_i32, %c0_i32_0 : i32, i32
  }
  func.func @transform_5(%arg0: i32) -> (i32, i32) {
    %c0_i32 = arith.constant 0 : i32
    %c0_i32_0 = arith.constant 0 : i32
    return %arg0, %c0_i32 : i32, i32
  }
}

</mosaic_0001>

<bundles_post_ra>
// kernel: tpu_custom_call.1
= control target key start
LH: loop header
LB: loop body
LE: loop exit
PB: predicated region body
PF: predicated region fallthrough
CT: control target
= control target key end

     0   :  { %10 = vsyncpa [#allocation6], 0  ;;  %s1967_s0 = inlined_call_operand.hbm [shape: bf16[240,128], index: 0, kind: input, shape index: {}]   ;;  %s1968_s1 = inlined_call_operand.hbm [shape: bf16[1,128,384], index: 1, kind: input, shape index: {}]   ;;  %s1969_s2 = inlined_call_operand.hbm [shape: f32[1,384], index: 2, kind: input, shape index: {}]   ;;  %s1970_s3 = inlined_call_operand.hbm [shape: bf16[384,128], index: 3, kind: input, shape index: {}]   ;;  %s1971_s4 = inlined_call_operand.vmem [shape: f32[1,128], index: 4, kind: input, shape index: {}]   ;;  %s1972_s5 = inlined_call_operand.hbm [shape: f32[16,128], index: 5, kind: output, shape index: {}]  }
   0x1   :  { %11 = vsyncpa [#allocation9], 0 }
   0x2   :  { %12 = vsyncpa [#allocation12], 0  ;;  %s31_s20 = sshll.u32 %s1968_s1, 4  ;;  %s32_s20 = int_to_ptr.hbm [resolvable:$true] %s31_s20 }
   0x3   :  { %13 = vsyncpa [#allocation7], 0  ;;  %s1748_s21 = smov [#allocation8]   ;;  %s18_s25 = sshll.u32 %s1967_s0, 4  ;;  %s19_s25 = int_to_ptr.hbm [resolvable:$true] %s18_s25 }
   0x4   :  { %s33_s22 = sshll.u32 %s1748_s21, 4  ;;  %s1749_s26 = smov 192   ;;  %s34_s22 = int_to_ptr.vmem [resolvable:$true] %s33_s22 }
   0x5   :  { %s1750_s27 = smov 12   ;;  %s1751_s28 = smov [#allocation5]  }
   0x6   :  { %39 = dma.hbm_to_vmem [thread:$0]  %s32_s20, 3072, %s34_s22, [#allocation9], %s1749_s26, %s1749_s26, %s1750_s27  }
   0x7   :  { %s20_s29 = sshll.u32 %s1751_s28, 4  ;;  %s1752_s30 = smov 64   ;;  %s21_s29 = int_to_ptr.vmem [resolvable:$true] %s20_s29 }
   0x8   :  { %s1753_s6 = smov 4   ;;  %s45_s8 = sshll.u32 %s1969_s2, 4  ;;  %s46_s8 = int_to_ptr.hbm [resolvable:$true] %s45_s8 }
   0x9   :  { %26 = dma.hbm_to_vmem [thread:$0]  %s19_s25, 1920, %s21_s29, [#allocation6], %s1752_s30, %s1752_s30, %s1753_s6  }
   0xa   :  { %s1754_s9 = smov [#allocation10]   ;;  %s55_s12 = sshll.u32 %s1970_s3, 4  ;;  %s56_s12 = int_to_ptr.hbm [resolvable:$true] %s55_s12 }
   0xb   :  { %s47_s10 = sshll.u32 %s1754_s9, 4  ;;  %s1755_s13 = smov [#allocation11]   ;;  %s48_s10 = int_to_ptr.vmem [resolvable:$true] %s47_s10 }
   0xc   :  { %50 = dma.hbm_to_vmem [thread:$0]  %s46_s8, 48, %s48_s10, [#allocation9]  }
   0xd   :  { %s57_s14 = sshll.u32 %s1755_s13, 4  ;;  %s58_s14 = int_to_ptr.vmem [resolvable:$true] %s57_s14 }
   0xe   :  { %63 = dma.hbm_to_vmem [thread:$0]  %s56_s12, 3072, %s58_s14, [#allocation12], %s1752_s30, %s1752_s30, %s1753_s6  }
   0xf   :  { %1740 = dma.done.wait [#allocation6], 1920  }
  0x10   :  { %1741 = vsyncadd [#allocation6], 4294965376 }
  0x11   :  { %1742 = dma.done.wait [#allocation9], 3120  }
  0x12   :  { %1743 = vsyncadd [#allocation9], 4294964176 }
  0x13   :  { %1744 = dma.done.wait [#allocation12], 3072  }
  0x14   :  { %1745 = vsyncadd [#allocation12], 4294964224  ;;  %v1379_v0 = vld [vmem:[#allocation8 + $0xa8] sm:$0xf]  ;;  %v1536_v1 = vld [vmem:[#allocation8 + $0xb0] sm:$0xf0] }
  0x15   :  { %v1535_v2 = vld [vmem:[#allocation8 + $0xac] sm:$0xf]  ;;  %v1380_v3 = vor.u32 %v1536_v1, %v1379_v0  ;;  %v1381_v4 = vld [vmem:[#allocation8 + $0xb4] sm:$0xf0]  ;;  %v1387_v5 = vld [vmem:[#allocation8 + $0xb0] sm:$0xf] }
  0x16   :  { %v1537_v6 = vld [vmem:[#allocation8 + $0xb8] sm:$0xf0]  ;;  %v1801_v7 = vor.u32 %v1535_v2, %v1381_v4  ;;  %v1367_v9 = vld [vmem:[#allocation8 + $0x90] sm:$0xf]  ;;  %v1532_v11 = vld [vmem:[#allocation8 + $0x94] sm:$0xf] }
  0x17   :  { %v1803_v8 = vor.u32 %v1537_v6, %v1387_v5  ;;  %v1533_v10 = vld [vmem:[#allocation8 + $0x98] sm:$0xf0]  ;;  %362 = vmatpush.bf16.msra.mxu0 %v1380_v3  ;;  %v1369_v13 = vld [vmem:[#allocation8 + $0x9c] sm:$0xf0]  ;;  %v1375_v14 = vld [vmem:[#allocation8 + $0x98] sm:$0xf]  ;;  %1565 = vmatpush.bf16.msra.mxu3 %v1380_v3 }
  0x18   :  { %v1368_v12 = vor.u32 %v1533_v10, %v1367_v9  ;;  %v1534_v15 = vld [vmem:[#allocation8 + $0xa0] sm:$0xf0]  ;;  %446 = vmatpush.bf16.msra.mxu1 %v1801_v7  ;;  %v1807_v16 = vor.u32 %v1532_v11, %v1369_v13  ;;  %v1355_v18 = vld [vmem:[#allocation8 + $0x78] sm:$0xf]  ;;  %v1529_v20 = vld [vmem:[#allocation8 + $0x7c] sm:$0xf] }
  0x19   :  { %530 = vmatpush.bf16.msra.mxu2 %v1803_v8  ;;  %v1809_v17 = vor.u32 %v1534_v15, %v1375_v14  ;;  %v1530_v19 = vld [vmem:[#allocation8 + $0x80] sm:$0xf0]  ;;  %v1357_v21 = vld [vmem:[#allocation8 + $0x84] sm:$0xf0]  ;;  %v1363_v22 = vld [vmem:[#allocation8 + $0x80] sm:$0xf] }
  0x1a   :  { %v1531_v23 = vld [vmem:[#allocation8 + $0x88] sm:$0xf0]  ;;  %v1356_v24 = vor.u32 %v1530_v19, %v1355_v18  ;;  %v1813_v25 = vor.u32 %v1529_v20, %v1357_v21  ;;  %v1343_v27 = vld [vmem:[#allocation8 + $0x60] sm:$0xf]  ;;  %v1526_v29 = vld [vmem:[#allocation8 + $0x64] sm:$0xf] }
  0x1b   :  { %363 = vmatpush.bf16.msra.mxu0 %v1368_v12  ;;  %1566 = vmatpush.bf16.msra.mxu3 %v1368_v12  ;;  %v1815_v26 = vor.u32 %v1531_v23, %v1363_v22  ;;  %v1527_v28 = vld [vmem:[#allocation8 + $0x68] sm:$0xf0]  ;;  %v1345_v30 = vld [vmem:[#allocation8 + $0x6c] sm:$0xf0]  ;;  %v1351_v31 = vld [vmem:[#allocation8 + $0x68] sm:$0xf] }
  0x1c   :  { %447 = vmatpush.bf16.msra.mxu1 %v1807_v16  ;;  %v1528_v32 = vld [vmem:[#allocation8 + $0x70] sm:$0xf0]  ;;  %v1344_v33 = vor.u32 %v1527_v28, %v1343_v27  ;;  %v1819_v34 = vor.u32 %v1526_v29, %v1345_v30  ;;  %v1331_v36 = vld [vmem:[#allocation8 + $0x48] sm:$0xf]  ;;  %v1523_v38 = vld [vmem:[#allocation8 + $0x4c] sm:$0xf] }
  0x1d   :  { %531 = vmatpush.bf16.msra.mxu2 %v1809_v17  ;;  %v1821_v35 = vor.u32 %v1528_v32, %v1351_v31  ;;  %v1524_v37 = vld [vmem:[#allocation8 + $0x50] sm:$0xf0]  ;;  %v1333_v39 = vld [vmem:[#allocation8 + $0x54] sm:$0xf0]  ;;  %v1339_v40 = vld [vmem:[#allocation8 + $0x50] sm:$0xf] }
  0x1e   :  { %v1525_v41 = vld [vmem:[#allocation8 + $0x58] sm:$0xf0]  ;;  %v1319_v42 = vld [vmem:[#allocation8 + $0x30] sm:$0xf]  ;;  %v1332_v43 = vor.u32 %v1524_v37, %v1331_v36  ;;  %v1520_v45 = vld [vmem:[#allocation8 + $0x34] sm:$0xf]  ;;  %v1336_v47 = vor.u32 %v1523_v38, %v1333_v39 }
  0x1f   :  { %364 = vmatpush.bf16.msra.mxu0 %v1356_v24  ;;  %1567 = vmatpush.bf16.msra.mxu3 %v1356_v24  ;;  %v1521_v44 = vld [vmem:[#allocation8 + $0x38] sm:$0xf0]  ;;  %v1321_v46 = vld [vmem:[#allocation8 + $0x3c] sm:$0xf0]  ;;  %v1825_v48 = vor.u32 %v1525_v41, %v1339_v40  ;;  %v1327_v49 = vld [vmem:[#allocation8 + $0x38] sm:$0xf] }
  0x20   :  { %448 = vmatpush.bf16.msra.mxu1 %v1813_v25  ;;  %v1522_v50 = vld [vmem:[#allocation8 + $0x40] sm:$0xf0]  ;;  %v1320_v51 = vor.u32 %v1521_v44, %v1319_v42  ;;  %v1324_v52 = vor.u32 %v1520_v45, %v1321_v46  ;;  %v1307_v54 = vld [vmem:[#allocation8 + $0x18] sm:$0xf]  ;;  %v1517_v56 = vld [vmem:[#allocation8 + $0x1c] sm:$0xf] }
  0x21   :  { %532 = vmatpush.bf16.msra.mxu2 %v1815_v26  ;;  %v1828_v53 = vor.u32 %v1522_v50, %v1327_v49  ;;  %v1518_v55 = vld [vmem:[#allocation8 + $0x20] sm:$0xf0]  ;;  %v1309_v57 = vld [vmem:[#allocation8 + $0x24] sm:$0xf0]  ;;  %v1315_v58 = vld [vmem:[#allocation8 + $0x20] sm:$0xf] }
  0x22   :  { %v1519_v59 = vld [vmem:[#allocation8 + $0x28] sm:$0xf0]  ;;  %v1308_v60 = vor.u32 %v1518_v55, %v1307_v54  ;;  %v1312_v61 = vor.u32 %v1517_v56, %v1309_v57  ;;  %v1295_v63 = vld [vmem:[#allocation8] sm:$0xf]  ;;  %v1514_v1 = vld [vmem:[#allocation8 + $0x4] sm:$0xf] }
  0x23   :  { %365 = vmatpush.bf16.msra.mxu0 %v1344_v33  ;;  %1568 = vmatpush.bf16.msra.mxu3 %v1344_v33  ;;  %v1831_v62 = vor.u32 %v1519_v59, %v1315_v58  ;;  %v1515_v0 = vld [vmem:[#allocation8 + $0x8] sm:$0xf0]  ;;  %v1297_v2 = vld [vmem:[#allocation8 + $0xc] sm:$0xf0]  ;;  %v1303_v3 = vld [vmem:[#allocation8 + $0x8] sm:$0xf] }
  0x24   :  { %449 = vmatpush.bf16.msra.mxu1 %v1819_v34  ;;  %v1516_v4 = vld [vmem:[#allocation8 + $0x10] sm:$0xf0]  ;;  %v1296_v5 = vor.u32 %v1515_v0, %v1295_v63  ;;  %v1300_v6 = vor.u32 %v1514_v1, %v1297_v2  ;;  %v1499_v10 = vld [vmem:[#allocation5] sm:$0xff]  ;;  %v1501_v12 = vld [vmem:[#allocation5 + $0x10] sm:$0xff]  ;;  %s1756_s15 = smov [#allocation13]   ;;  %s1218_s19 = sshll.u32 %s1972_s5, 4  ;;  %s1219_s19 = int_to_ptr.hbm [resolvable:$true] %s1218_s19 }
  0x25   :  { %533 = vmatpush.bf16.msra.mxu2 %v1821_v35  ;;  %v1834_v9 = vor.u32 %v1516_v4, %v1303_v3  ;;  %v1500_v11 = vld [vmem:[#allocation5 + $0x8] sm:$0xff]  ;;  %v1503_v13 = vld [vmem:[#allocation5 + $0x20] sm:$0xff]  ;;  %v1505_v15 = vld [vmem:[#allocation5 + $0x30] sm:$0xff]  ;;  %s1216_s16 = sshll.u32 %s1756_s15, 4  ;;  %s1758_s20 = smov 8   ;;  %s1217_s16 = int_to_ptr.vmem [resolvable:$true] %s1216_s16 }
  0x26   :  { %v1504_v14 = vld [vmem:[#allocation5 + $0x28] sm:$0xff]  ;;  %v1507_v19 = vld [vmem:[#allocation5 + $0x40] sm:$0xff]  ;;  %v1509_v37 = vld [vmem:[#allocation5 + $0x50] sm:$0xff] }
  0x27   :  { %366 = vmatpush.bf16.msra.mxu0 %v1332_v43  ;;  %1569 = vmatpush.bf16.msra.mxu3 %v1332_v43  ;;  %v1841_v18 = vld [vmem:[#allocation5 + $0x68] sm:$0xff]  ;;  %v1510_v45 = vld [vmem:[#allocation5 + $0x58] sm:$0xff] }
  0x28   :  { %450 = vmatpush.bf16.msra.mxu1 %v1336_v47  ;;  %v1508_v27 = vld [vmem:[#allocation5 + $0x48] sm:$0xff] }
  0x29   :  { %534 = vmatpush.bf16.msra.mxu2 %v1825_v48 }
  0x2b   :  { %367 = vmatpush.bf16.msra.mxu0 %v1320_v51  ;;  %1570 = vmatpush.bf16.msra.mxu3 %v1320_v51 }
  0x2c   :  { %451 = vmatpush.bf16.msra.mxu1 %v1324_v52 }
  0x2d   :  { %535 = vmatpush.bf16.msra.mxu2 %v1828_v53 }
  0x2f   :  { %368 = vmatpush.bf16.msra.mxu0 %v1308_v60  ;;  %1571 = vmatpush.bf16.msra.mxu3 %v1308_v60 }
  0x30   :  { %452 = vmatpush.bf16.msra.mxu1 %v1312_v61 }
  0x31   :  { %536 = vmatpush.bf16.msra.mxu2 %v1831_v62 }
  0x33   :  { %369 = vmatpush.bf16.msra.mxu0 %v1296_v5  ;;  %1572 = vmatpush.bf16.msra.mxu3 %v1296_v5 }
  0x34   :  { %453 = vmatpush.bf16.msra.mxu1 %v1300_v6 }
  0x35   :  { %537 = vmatpush.bf16.msra.mxu2 %v1834_v9 }
  0x36   :  { %370 = vmatmul.bf16.vlgmr.msra.gmra.mxu0 %v1499_v10  ;;  %435 = vmatmul.bf16.vlgmr.msra.gmra.mxu3 %v1841_v18 }
  0x37   :  { %1573 = vmatpush.bf16.msrb.mxu3 %v1801_v7  ;;  %454 = vmatmul.bf16.vlgmr.msra.gmra.mxu1 %v1499_v10  ;;  %v1502_v7 = vld [vmem:[#allocation5 + $0x18] sm:$0xff] }
  0x38   :  { %538 = vmatmul.bf16.vlgmr.msra.gmra.mxu2 %v1499_v10 }
  0x3b   :  { %1574 = vmatpush.bf16.msrb.mxu3 %v1807_v16  ;;  %v1506_v16 = vld [vmem:[#allocation5 + $0x38] sm:$0xff] }
  0x3f   :  { %1575 = vmatpush.bf16.msrb.mxu3 %v1813_v25  ;;  %v1847_v25 = vld [vmem:[#allocation5 + $0x70] sm:$0xff] }
  0x43   :  { %1576 = vmatpush.bf16.msrb.mxu3 %v1819_v34 }
  0x46   :  { %375 = vmatmul.bf16.gmra.mxu0 %v1500_v11  ;;  %440 = vmatmul.bf16.gmra.mxu3 %v1847_v25 }
  0x47   :  { %1577 = vmatpush.bf16.msrb.mxu3 %v1336_v47  ;;  %459 = vmatmul.bf16.gmra.mxu1 %v1500_v11 }
  0x48   :  { %543 = vmatmul.bf16.gmra.mxu2 %v1500_v11 }
  0x4b   :  { %1578 = vmatpush.bf16.msrb.mxu3 %v1324_v52 }
  0x4f   :  { %1579 = vmatpush.bf16.msrb.mxu3 %v1312_v61 }
  0x53   :  { %1580 = vmatpush.bf16.msrb.mxu3 %v1300_v6 }
  0x56   :  { %380 = vmatmul.bf16.gmra.mxu0 %v1501_v12  ;;  %519 = vmatmul.bf16.vlgmr.msrb.gmra.mxu3 %v1841_v18 }
  0x57   :  { %464 = vmatmul.bf16.gmra.mxu1 %v1501_v12  ;;  %1581 = vmatpush.bf16.msra.mxu3 %v1803_v8 }
  0x58   :  { %548 = vmatmul.bf16.gmra.mxu2 %v1501_v12 }
  0x5b   :  { %1582 = vmatpush.bf16.msra.mxu3 %v1809_v17 }
  0x5f   :  { %1583 = vmatpush.bf16.msra.mxu3 %v1815_v26 }
  0x63   :  { %1584 = vmatpush.bf16.msra.mxu3 %v1821_v35 }
  0x66   :  { %385 = vmatmul.bf16.gmra.mxu0 %v1502_v7  ;;  %524 = vmatmul.bf16.gmra.mxu3 %v1847_v25 }
  0x67   :  { %469 = vmatmul.bf16.gmra.mxu1 %v1502_v7  ;;  %1585 = vmatpush.bf16.msra.mxu3 %v1825_v48 }
  0x68   :  { %553 = vmatmul.bf16.gmra.mxu2 %v1502_v7 }
  0x6b   :  { %1586 = vmatpush.bf16.msra.mxu3 %v1828_v53 }
  0x6f   :  { %1587 = vmatpush.bf16.msra.mxu3 %v1831_v62  ;;  %v1511_v62 = vld [vmem:[#allocation5 + $0x60] sm:$0xff] }
  0x73   :  { %1588 = vmatpush.bf16.msra.mxu3 %v1834_v9 }
  0x76   :  { %390 = vmatmul.bf16.gmra.mxu0 %v1503_v13  ;;  %603 = vmatmul.bf16.vlgmr.msra.gmra.mxu3 %v1841_v18 }
  0x77   :  { %474 = vmatmul.bf16.gmra.mxu1 %v1503_v13 }
  0x78   :  { %558 = vmatmul.bf16.gmra.mxu2 %v1503_v13 }
  0x86   :  { %395 = vmatmul.bf16.gmra.mxu0 %v1504_v14  ;;  %608 = vmatmul.bf16.gmra.mxu3 %v1847_v25 }
  0x87   :  { %479 = vmatmul.bf16.gmra.mxu1 %v1504_v14 }
  0x88   :  { %563 = vmatmul.bf16.gmra.mxu2 %v1504_v14 }
  0x96   :  { %400 = vmatmul.bf16.gmra.mxu0 %v1505_v15 }
  0x97   :  { %484 = vmatmul.bf16.gmra.mxu1 %v1505_v15 }
  0x98   :  { %568 = vmatmul.bf16.gmra.mxu2 %v1505_v15 }
  0xa6   :  { %405 = vmatmul.bf16.gmra.mxu0 %v1506_v16 }
  0xa7   :  { %489 = vmatmul.bf16.gmra.mxu1 %v1506_v16 }
  0xa8   :  { %573 = vmatmul.bf16.gmra.mxu2 %v1506_v16 }
  0xb3   :  { %v371_v20 = vpop.f32.mrf.mxu0 }
  0xb4   :  { %v455_v21 = vpop.f32.mrf.mxu1 }
  0xb6   :  { %410 = vmatmul.bf16.gmra.mxu0 %v1507_v19 }
  0xb7   :  { %494 = vmatmul.bf16.gmra.mxu1 %v1507_v19 }
  0xb8   :  { %578 = vmatmul.bf16.gmra.mxu2 %v1507_v19 }
  0xbb   :  { %v539_v22 = vpop.f32.mrf.mxu2  ;;  %v373_v23 = vpop.f32.mrf.mxu0 }
  0xbc   :  { %v457_v24 = vpop.f32.mrf.mxu1 }
  0xc3   :  { %v541_v8 = vpop.f32.mrf.mxu2  ;;  %v376_v28 = vpop.f32.mrf.mxu0 }
  0xc4   :  { %v734_v17 = vmax.f32 %v371_v20, %v376_v28  ;;  %v460_v29 = vpop.f32.mrf.mxu1 }
  0xc5   :  { %v792_v30 = vmax.f32 %v455_v21, %v460_v29 }
  0xc6   :  { %415 = vmatmul.bf16.gmra.mxu0 %v1508_v27 }
  0xc7   :  { %499 = vmatmul.bf16.gmra.mxu1 %v1508_v27 }
  0xc8   :  { %583 = vmatmul.bf16.gmra.mxu2 %v1508_v27 }
  0xcb   :  { %v544_v26 = vpop.f32.mrf.mxu2  ;;  %v378_v32 = vpop.f32.mrf.mxu0 }
  0xcc   :  { %v846_v31 = vmax.f32 %v539_v22, %v544_v26  ;;  %v735_v33 = vmax.f32 %v373_v23, %v378_v32  ;;  %v462_v34 = vpop.f32.mrf.mxu1 }
  0xcd   :  { %v793_v35 = vmax.f32 %v457_v24, %v462_v34 }
  0xd3   :  { %v546_v36 = vpop.f32.mrf.mxu2  ;;  %v381_v39 = vpop.f32.mrf.mxu0 }
  0xd4   :  { %v847_v38 = vmax.f32 %v541_v8, %v546_v36  ;;  %v465_v40 = vpop.f32.mrf.mxu1 }
  0xd6   :  { %420 = vmatmul.bf16.gmra.mxu0 %v1509_v37 }
  0xd7   :  { %504 = vmatmul.bf16.gmra.mxu1 %v1509_v37 }
  0xd8   :  { %588 = vmatmul.bf16.gmra.mxu2 %v1509_v37 }
  0xdb   :  { %v549_v41 = vpop.f32.mrf.mxu2  ;;  %v383_v42 = vpop.f32.mrf.mxu0 }
  0xdc   :  { %v467_v43 = vpop.f32.mrf.mxu1 }
  0xe3   :  { %v551_v44 = vpop.f32.mrf.mxu2  ;;  %v386_v46 = vpop.f32.mrf.mxu0 }
  0xe4   :  { %v736_v47 = vmax.f32 %v381_v39, %v386_v46  ;;  %v470_v48 = vpop.f32.mrf.mxu1 }
  0xe5   :  { %v794_v49 = vmax.f32 %v465_v40, %v470_v48  ;;  %v1893_v48 = vpop.f32.mrf.mxu3 }
  0xe6   :  { %v1857_v50 = vmax.f32 %v734_v17, %v736_v47  ;;  %425 = vmatmul.bf16.gmra.mxu0 %v1510_v45 }
  0xe7   :  { %v1859_v51 = vmax.f32 %v792_v30, %v794_v49  ;;  %509 = vmatmul.bf16.gmra.mxu1 %v1510_v45 }
  0xe8   :  { %593 = vmatmul.bf16.gmra.mxu2 %v1510_v45 }
  0xeb   :  { %v554_v52 = vpop.f32.mrf.mxu2  ;;  %v388_v54 = vpop.f32.mrf.mxu0 }
  0xec   :  { %v848_v53 = vmax.f32 %v549_v41, %v554_v52  ;;  %v737_v55 = vmax.f32 %v383_v42, %v388_v54  ;;  %v472_v56 = vpop.f32.mrf.mxu1 }
  0xed   :  { %v795_v58 = vmax.f32 %v467_v43, %v472_v56 }
  0xee   :  { %v1861_v57 = vmax.f32 %v846_v31, %v848_v53  ;;  %v1863_v59 = vmax.f32 %v735_v33, %v737_v55  ;;  %v1548_v55 = vld [vmem:[#allocation11 + $0x38] sm:$0xff] }
  0xef   :  { %v1865_v60 = vmax.f32 %v793_v35, %v795_v58  ;;  %v1905_v58 = vpop.f32.mrf.mxu3  ;;  %1166 = vmatpush.bf16.msrb.mxu3 %v1548_v55 }
  0xf3   :  { %v556_v61 = vpop.f32.mrf.mxu2  ;;  %v391_v0 = vpop.f32.mrf.mxu0 }
  0xf4   :  { %v849_v63 = vmax.f32 %v551_v44, %v556_v61  ;;  %v475_v1 = vpop.f32.mrf.mxu1 }
  0xf6   :  { %v1868_v2 = vmax.f32 %v847_v38, %v849_v63  ;;  %430 = vmatmul.bf16.gmra.mxu0 %v1511_v62 }
  0xf7   :  { %514 = vmatmul.bf16.gmra.mxu1 %v1511_v62 }
  0xf8   :  { %598 = vmatmul.bf16.gmra.mxu2 %v1511_v62  ;;  %v1547_v62 = vld [vmem:[#allocation11 + $0x30] sm:$0xff] }
  0xf9   :  { %1167 = vmatpush.bf16.msrb.mxu3 %v1547_v62 }
  0xfb   :  { %v559_v3 = vpop.f32.mrf.mxu2  ;;  %v393_v4 = vpop.f32.mrf.mxu0 }
  0xfc   :  { %v477_v5 = vpop.f32.mrf.mxu1 }
 0x103   :  { %v561_v6 = vpop.f32.mrf.mxu2  ;;  %v396_v9 = vpop.f32.mrf.mxu0 }
 0x104   :  { %v738_v10 = vmax.f32 %v391_v0, %v396_v9  ;;  %v480_v11 = vpop.f32.mrf.mxu1  ;;  %v1546_v0 = vld [vmem:[#allocation11 + $0x28] sm:$0xff]  ;;  %v1544_v9 = vld [vmem:[#allocation11 + $0x18] sm:$0xff] }
 0x105   :  { %v796_v12 = vmax.f32 %v475_v1, %v480_v11  ;;  %1168 = vmatpush.bf16.msrb.mxu3 %v1546_v0 }
 0x10b   :  { %v564_v7 = vpop.f32.mrf.mxu2  ;;  %v398_v14 = vpop.f32.mrf.mxu0 }
 0x10c   :  { %v850_v13 = vmax.f32 %v559_v3, %v564_v7  ;;  %v739_v15 = vmax.f32 %v393_v4, %v398_v14  ;;  %v482_v16 = vpop.f32.mrf.mxu1  ;;  %v441_v4 = vpop.f32.mrf.mxu3  ;;  %v1543_v7 = vld [vmem:[#allocation11 + $0x10] sm:$0xff]  ;;  %v1542_v14 = vld [vmem:[#allocation11 + $0x8] sm:$0xff] }
 0x10d   :  { %v797_v18 = vmax.f32 %v477_v5, %v482_v16  ;;  %v1545_v5 = vld [vmem:[#allocation11 + $0x20] sm:$0xff] }
 0x10e   :  { %1169 = vmatpush.bf16.msrb.mxu3 %v1545_v5 }
 0x112   :  { %1170 = vmatpush.bf16.msrb.mxu3 %v1544_v9 }
 0x113   :  { %v566_v19 = vpop.f32.mrf.mxu2  ;;  %v401_v21 = vpop.f32.mrf.mxu0 }
 0x114   :  { %v851_v20 = vmax.f32 %v561_v6, %v566_v19  ;;  %v485_v22 = vpop.f32.mrf.mxu1  ;;  %v1541_v19 = vld [vmem:[#allocation11] sm:$0xff] }
 0x116   :  { %1171 = vmatpush.bf16.msrb.mxu3 %v1543_v7 }
 0x11a   :  { %1172 = vmatpush.bf16.msrb.mxu3 %v1542_v14 }
 0x11b   :  { %v569_v23 = vpop.f32.mrf.mxu2  ;;  %v403_v24 = vpop.f32.mrf.mxu0 }
 0x11c   :  { %v487_v8 = vpop.f32.mrf.mxu1 }
 0x11e   :  { %1173 = vmatpush.bf16.msrb.mxu3 %v1541_v19 }
 0x123   :  { %v571_v27 = vpop.f32.mrf.mxu2  ;;  %v406_v25 = vpop.f32.mrf.mxu0 }
 0x124   :  { %v740_v28 = vmax.f32 %v401_v21, %v406_v25  ;;  %v490_v17 = vpop.f32.mrf.mxu1 }
 0x125   :  { %v798_v29 = vmax.f32 %v485_v22, %v490_v17 }
 0x126   :  { %v1871_v30 = vmax.f32 %v738_v10, %v740_v28 }
 0x127   :  { %v1873_v26 = vmax.f32 %v796_v12, %v798_v29  ;;  %v1917_v12 = vpop.f32.mrf.mxu3  ;;  %v1553_v29 = vld [vmem:[#allocation11 + $0x60] sm:$0xff] }
 0x128   :  { %v756_v31 = vmax.f32 %v1857_v50, %v1871_v30 }
 0x129   :  { %v812_v32 = vmax.f32 %v1859_v51, %v1873_v26 }
 0x12b   :  { %v574_v33 = vpop.f32.mrf.mxu2  ;;  %v408_v35 = vpop.f32.mrf.mxu0 }
 0x12c   :  { %v852_v34 = vmax.f32 %v569_v23, %v574_v33  ;;  %v741_v36 = vmax.f32 %v403_v24, %v408_v35  ;;  %v492_v37 = vpop.f32.mrf.mxu1 }
 0x12d   :  { %v799_v39 = vmax.f32 %v487_v8, %v492_v37  ;;  %v1555_v8 = vld [vmem:[#allocation11 + $0x70] sm:$0xff] }
 0x12e   :  { %v1879_v38 = vmax.f32 %v850_v13, %v852_v34  ;;  %v1881_v40 = vmax.f32 %v739_v15, %v741_v36  ;;  %v1552_v34 = vld [vmem:[#allocation11 + $0x58] sm:$0xff] }
 0x12f   :  { %v1883_v41 = vmax.f32 %v797_v18, %v799_v39  ;;  %v520_v18 = vpop.f32.mrf.mxu3  ;;  %v1551_v39 = vld [vmem:[#allocation11 + $0x50] sm:$0xff] }
 0x130   :  { %v864_v42 = vmax.f32 %v1861_v57, %v1879_v38  ;;  %v757_v43 = vmax.f32 %v1863_v59, %v1881_v40 }
 0x131   :  { %v813_v44 = vmax.f32 %v1865_v60, %v1883_v41 }
 0x133   :  { %v576_v45 = vpop.f32.mrf.mxu2  ;;  %v1891_v47 = vpop.f32.mrf.mxu0 }
 0x134   :  { %v853_v46 = vmax.f32 %v571_v27, %v576_v45  ;;  %v1895_v49 = vpop.f32.mrf.mxu1  ;;  %v1554_v27 = vld [vmem:[#allocation11 + $0x68] sm:$0xff] }
 0x136   :  { %v1897_v52 = vmax.f32 %v851_v20, %v853_v46  ;;  %v1556_v20 = vld [vmem:[#allocation11 + $0x78] sm:$0xff]  ;;  %v1550_v46 = vld [vmem:[#allocation11 + $0x48] sm:$0xff] }
 0x137   :  { %1180 = vmatpush.bf16.msra.mxu3 %v1556_v20  ;;  %v1923_v24 = vpop.f32.mrf.mxu3  ;;  %v1549_v20 = vld [vmem:[#allocation11 + $0x40] sm:$0xff] }
 0x138   :  { %v865_v53 = vmax.f32 %v1868_v2, %v1897_v52 }
 0x13b   :  { %v1901_v54 = vpop.f32.mrf.mxu2  ;;  %v1903_v56 = vpop.f32.mrf.mxu0  ;;  %1181 = vmatpush.bf16.msra.mxu3 %v1555_v8 }
 0x13c   :  { %v1907_v61 = vpop.f32.mrf.mxu1 }
 0x13f   :  { %1182 = vmatpush.bf16.msra.mxu3 %v1554_v27  ;;  %v525_v33 = vpop.f32.mrf.mxu3 }
 0x143   :  { %v1909_v63 = vpop.f32.mrf.mxu2  ;;  %v416_v1 = vpop.f32.mrf.mxu0  ;;  %1183 = vmatpush.bf16.msra.mxu3 %v1553_v29 }
 0x144   :  { %v500_v3 = vpop.f32.mrf.mxu1  ;;  %v742_v7 = vmax.f32 %v1891_v47, %v416_v1 }
 0x145   :  { %v800_v5 = vmax.f32 %v1895_v49, %v500_v3 }
 0x147   :  { %1184 = vmatpush.bf16.msra.mxu3 %v1552_v34  ;;  %v527_v45 = vpop.f32.mrf.mxu3 }
 0x14b   :  { %v1911_v6 = vpop.f32.mrf.mxu2  ;;  %v1913_v10 = vpop.f32.mrf.mxu0  ;;  %1185 = vmatpush.bf16.msra.mxu3 %v1551_v39 }
 0x14c   :  { %v1915_v11 = vpop.f32.mrf.mxu1 }
 0x14d   :  { %v801_v1 = vmax.f32 %v1907_v61, %v1915_v11 }
 0x14f   :  { %1186 = vmatpush.bf16.msra.mxu3 %v1550_v46  ;;  %v604_v8 = vpop.f32.mrf.mxu3 }
 0x153   :  { %v1919_v13 = vpop.f32.mrf.mxu2  ;;  %v421_v15 = vpop.f32.mrf.mxu0  ;;  %1187 = vmatpush.bf16.msra.mxu3 %v1549_v20 }
 0x154   :  { %v505_v16 = vpop.f32.mrf.mxu1 }
 0x157   :  { %v606_v61 = vpop.f32.mrf.mxu3 }
 0x15b   :  { %v589_v21 = vpop.f32.mrf.mxu2  ;;  %v1921_v22 = vpop.f32.mrf.mxu0 }
 0x15c   :  { %v507_v23 = vpop.f32.mrf.mxu1 }
 0x163   :  { %v1925_v25 = vpop.f32.mrf.mxu2  ;;  %v426_v28 = vpop.f32.mrf.mxu0 }
 0x164   :  { %v510_v17 = vpop.f32.mrf.mxu1  ;;  %v744_v62 = vmax.f32 %v421_v15, %v426_v28  ;;  %v854_v15 = vmax.f32 %v1901_v54, %v1911_v6  ;;  %v1601_v28 = vld [vmem:[#allocation10 + $0x1] ss:$0 sm:$0xff] }
 0x165   :  { %v802_v55 = vmax.f32 %v505_v16, %v510_v17  ;;  %v1600_v17 = vld [vmem:[#allocation10] ss:$0 sm:$0xff] }
 0x166   :  { %v752_v34 = vmax.f32 %v742_v7, %v744_v62 }
 0x167   :  { %v810_v27 = vmax.f32 %v800_v5, %v802_v55  ;;  %v609_v5 = vpop.f32.mrf.mxu3 }
 0x16b   :  { %v594_v35 = vpop.f32.mrf.mxu2  ;;  %v428_v36 = vpop.f32.mrf.mxu0 }
 0x16c   :  { %v512_v37 = vpop.f32.mrf.mxu1  ;;  %v856_v29 = vmax.f32 %v589_v21, %v594_v35 }
 0x16d   :  { %v803_v49 = vmax.f32 %v507_v23, %v512_v37  ;;  %v1602_v23 = vld [vmem:[#allocation10 + $0x2] ss:$0 sm:$0xff]  ;;  %v743_v37 = vmax.f32 %v1903_v56, %v1913_v10  ;;  %v855_v56 = vmax.f32 %v1909_v63, %v1919_v13 }
 0x16f   :  { %v811_v51 = vmax.f32 %v801_v1, %v803_v49 }
 0x173   :  { %v596_v0 = vpop.f32.mrf.mxu2  ;;  %v431_v9 = vpop.f32.mrf.mxu0 }
 0x174   :  { %v746_v14 = vmax.f32 %v431_v9, %v1893_v48  ;;  %v515_v19 = vpop.f32.mrf.mxu1  ;;  %v862_v48 = vmax.f32 %v854_v15, %v856_v29  ;;  %v857_v11 = vmax.f32 %v1925_v25, %v596_v0  ;;  %v1564_v29 = vld [vmem:[#allocation11 + $0xb8] sm:$0xff] }
 0x175   :  { %v804_v33 = vmax.f32 %v515_v19, %v520_v18  ;;  %v745_v18 = vmax.f32 %v1921_v22, %v428_v36 }
 0x176   :  { %v754_v39 = vmax.f32 %v746_v14, %v441_v4  ;;  %v863_v57 = vmax.f32 %v855_v56, %v857_v11  ;;  %v611_v14 = vpop.f32.mrf.mxu3 }
 0x177   :  { %v814_v16 = vmax.f32 %v810_v27, %v804_v33 }
 0x178   :  { %v758_v3 = vmax.f32 %v752_v34, %v754_v39  ;;  %v1563_v39 = vld [vmem:[#allocation11 + $0xb0] sm:$0xff] }
 0x179   :  { %v816_v47 = vmax.f32 %v812_v32, %v814_v16 }
 0x17a   :  { %v760_v4 = vmax.f32 %v756_v31, %v758_v3  ;;  %v753_v31 = vmax.f32 %v743_v37, %v745_v18  ;;  %v1562_v3 = vld [vmem:[#allocation11 + $0xa8] sm:$0xff] }
 0x17b   :  { %v599_v54 = vpop.f32.mrf.mxu2  ;;  %v892_v6 = vadd.f32 %v1601_v28, %v816_v47  ;;  %v433_v35 = vpop.f32.mrf.mxu0 }
 0x17c   :  { %v866_v21 = vmax.f32 %v862_v48, %v599_v54  ;;  %v878_v26 = vadd.f32 %v1600_v17, %v760_v4  ;;  %v747_v32 = vmax.f32 %v433_v35, %v1905_v58  ;;  %v517_v45 = vpop.f32.mrf.mxu1 }
 0x17d   :  { %1604 = vtanh.f32 %v892_v6  ;;  %v805_v30 = vmax.f32 %v517_v45, %v1923_v24  ;;  %v1561_v6 = vld [vmem:[#allocation11 + $0xa0] sm:$0xff] }
 0x17e   :  { %v868_v50 = vmax.f32 %v864_v42, %v866_v21  ;;  %v880_v22 = vmax.f32 %v878_v26, 0.0  ;;  %v755_v36 = vmax.f32 %v747_v32, %v1917_v12  ;;  %v1560_v32 = vld [vmem:[#allocation11 + $0x98] sm:$0xff] }
 0x17f   :  { %v815_v58 = vmax.f32 %v811_v51, %v805_v30 }
 0x180   :  { %v906_v10 = vadd.f32 %v1602_v23, %v868_v50  ;;  %v882_v46 = vpack.c.bf16 %v880_v22, %v880_v22  ;;  %v759_v55 = vmax.f32 %v753_v31, %v755_v36  ;;  %v1559_v31 = vld [vmem:[#allocation11 + $0x90] sm:$0xff]  ;;  %v1558_v22 = vld [vmem:[#allocation11 + $0x88] sm:$0xff]  ;;  %v1557_v36 = vld [vmem:[#allocation11 + $0x80] sm:$0xff] }
 0x181   :  { %v817_v25 = vmax.f32 %v813_v44, %v815_v58 }
 0x182   :  { %v1389_v62 = vmul.f32 -1.442695, %v906_v10  ;;  %884 = vst [vmem:[#allocation4] sm:$0xf] %v882_v46  ;;  %v761_v38 = vmax.f32 %v757_v43, %v759_v55 }
 0x183   :  { %v601_v42 = vpop.f32.mrf.mxu2  ;;  %v1605_v12 = vpop.eup %1604  ;;  %v893_v24 = vadd.f32 %v1601_v28, %v817_v25 }
 0x184   :  { %1606 = vpow2.f32 %v1389_v62  ;;  %v867_v63 = vmax.f32 %v863_v57, %v601_v42  ;;  %v896_v13 = vpack.c.bf16 %v1605_v12, %v1605_v12  ;;  %v879_v0 = vadd.f32 %v1600_v17, %v761_v38  ;;  %v1603_v57 = vld [vmem:[%s1971_s4] ss:$0 sm:$0xff]  ;;  %s1757_s4 = smov 128  }
 0x185   :  { %1608 = vtanh.f32 %v893_v24 }
 0x186   :  { %v869_v60 = vmax.f32 %v865_v53, %v867_v63  ;;  %898 = vst [vmem:[#allocation4 + $0x4] sm:$0xf] %v896_v13  ;;  %v881_v41 = vmax.f32 %v879_v0, 0.0 }
 0x188   :  { %v907_v44 = vadd.f32 %v1602_v23, %v869_v60  ;;  %v883_v9 = vpack.c.bf16 %v881_v41, %v881_v41 }
 0x189   :  { %v1393_v8 = vld [vmem:[#allocation4] sm:$0xf] }
 0x18a   :  { %v1607_v7 = vpop.eup %1606  ;;  %v1390_v59 = vmul.f32 -1.442695, %v907_v44  ;;  %885 = vst [vmem:[#allocation4 + $0xc] sm:$0xf] %v883_v9 }
 0x18b   :  { %v914_v40 = vadd.f32 1.0, %v1607_v7  ;;  %v1609_v43 = vpop.eup %1608 }
 0x18c   :  { %1610 = vpow2.f32 %v1390_v59  ;;  %v897_v19 = vpack.c.bf16 %v1609_v43, %v1609_v43 }
 0x18d   :  { %1612 = vrcp.f32 %v914_v40  ;;  %v927_v15 = vand.u32 2147483648, %v914_v40  ;;  %v925_v28 = vand.u32 2147483647, %v914_v40  ;;  %vm921_vm1 = vweird.f32 %v914_v40  ;;  %v1538_v26 = vld [vmem:[#allocation4 + $0x4] sm:$0xf] }
 0x18e   :  { %899 = vst [vmem:[#allocation4 + $0x10] sm:$0xf] %v897_v19 }
 0x18f   :  { %v928_v47 = vor.u32 1.1754944e-38, %v927_v15  ;;  %vm926_vm3 = vcmp.eq.f32.partialorder %v925_v28, 8.507059e+37 }
 0x191   :  { %v1539_v27 = vld [vmem:[#allocation4 + $0x8] sm:$0xf0] }
 0x192   :  { %v1611_v20 = vpop.eup %1610  ;;  %v1394_v53 = vor.u32 %v1539_v27, %v1393_v8 }
 0x193   :  { %v1613_v2 = vpop.eup %1612  ;;  %v915_v52 = vadd.f32 1.0, %v1611_v20 }
 0x194   :  { %v917_v33 = vmul.f32 %v1613_v2, %v914_v40  ;;  %1174 = vmatmul.bf16.vlgmr.msrb.gmra.mxu3 %v1394_v53  ;;  %vm922_vm0 = vweird.f32 %v1613_v2 }
 0x195   :  { %1614 = vrcp.f32 %v915_v52  ;;  %1194 = vmatpush.bf16.msrb.mxu3 %v1564_v29  ;;  %vm923_vm2 = vmor %vm921_vm1, %vm922_vm0  ;;  %v942_v21 = vand.u32 2147483648, %v915_v52  ;;  %v940_v35 = vand.u32 2147483647, %v915_v52  ;;  %v1395_v37 = vld [vmem:[#allocation4 + $0xc] sm:$0xf0]  ;;  %vm936_vm5 = vweird.f32 %v915_v52 }
 0x196   :  { %v918_v34 = vsub.f32 1.0, %v917_v33  ;;  %v1398_v61 = vor.u32 %v1538_v26, %v1395_v37 }
 0x197   :  { %v943_v45 = vor.u32 1.1754944e-38, %v942_v21  ;;  %vm941_vm7 = vcmp.eq.f32.partialorder %v940_v35, 8.507059e+37 }
 0x198   :  { %v919_v16 = vmul.f32 %v1613_v2, %v918_v34 }
 0x199   :  { %1195 = vmatpush.bf16.msrb.mxu3 %v1563_v39 }
 0x19a   :  { %v920_v49 = vadd.f32 %v1613_v2, %v919_v16 }
 0x19b   :  { %v1615_v17 = vpop.eup %1614 }
 0x19c   :  { %v924_v48 = vsel %vm923_vm2, %v1613_v2, %v920_v49  ;;  %v932_v1 = vmul.f32 %v1615_v17, %v915_v52  ;;  %vm937_vm4 = vweird.f32 %v1615_v17 }
 0x19d   :  { %v929_v18 = vsel %vm926_vm3, %v928_v47, %v924_v48  ;;  %1196 = vmatpush.bf16.msrb.mxu3 %v1562_v3  ;;  %vm938_vm6 = vmor %vm936_vm5, %vm937_vm4 }
 0x19e   :  { %v946_v4 = vpack.c.bf16 %v929_v18, %v929_v18  ;;  %v933_v54 = vsub.f32 1.0, %v932_v1 }
 0x1a0   :  { %948 = vst [vmem:[#allocation4 + $0x8] sm:$0xf] %v946_v4  ;;  %v934_v23 = vmul.f32 %v1615_v17, %v933_v54 }
 0x1a1   :  { %1197 = vmatpush.bf16.msrb.mxu3 %v1561_v6 }
 0x1a2   :  { %v935_v51 = vadd.f32 %v1615_v17, %v934_v23 }
 0x1a4   :  { %v939_v11 = vsel %vm938_vm6, %v1615_v17, %v935_v51  ;;  %1188 = vmatmul.bf16.vlgmr.msra.gmra.mxu3 %v1398_v61 }
 0x1a5   :  { %v944_v50 = vsel %vm941_vm7, %v943_v45, %v939_v11  ;;  %1198 = vmatpush.bf16.msrb.mxu3 %v1560_v32 }
 0x1a6   :  { %v947_v30 = vpack.c.bf16 %v944_v50, %v944_v50 }
 0x1a7   :  { %v1401_v10 = vld [vmem:[#allocation4 + $0x8] sm:$0xf] }
 0x1a8   :  { %949 = vst [vmem:[#allocation4 + $0x14] sm:$0xf] %v947_v30 }
 0x1a9   :  { %1199 = vmatpush.bf16.msrb.mxu3 %v1559_v31 }
 0x1ad   :  { %1200 = vmatpush.bf16.msrb.mxu3 %v1558_v22 }
 0x1af   :  { %v1540_v56 = vld [vmem:[#allocation4 + $0x10] sm:$0xf0] }
 0x1b0   :  { %v1402_v58 = vor.u32 %v1540_v56, %v1401_v10 }
 0x1b1   :  { %1201 = vmatpush.bf16.msrb.mxu3 %v1557_v36 }
 0x1b4   :  { %1202 = vmatmul.bf16.vlgmr.msrb.gmra.mxu3 %v1402_v58 }
 0x217   :  { %v1175_v46 = vpop.f32.mrf.mxu3 }
 0x218   :  { %v1176_v38 = vadd.f32 %v1603_v57, %v1175_v46 }
 0x21f   :  { %v1177_v55 = vpop.f32.mrf.mxu3 }
 0x220   :  { %v1178_v63 = vadd.f32 %v1603_v57, %v1177_v55 }
 0x227   :  { %v1189_v62 = vpop.f32.mrf.mxu3 }
 0x228   :  { %v1190_v42 = vadd.f32 %v1189_v62, %v1176_v38 }
 0x22f   :  { %v1191_v25 = vpop.f32.mrf.mxu3 }
 0x230   :  { %v1192_v13 = vadd.f32 %v1191_v25, %v1178_v63 }
 0x237   :  { %v1203_v12 = vpop.f32.mrf.mxu3 }
 0x238   :  { %v1204_v24 = vadd.f32 %v1203_v12, %v1190_v42 }
 0x23a   :  { %1616 = vtanh.f32 %v1204_v24 }
 0x23f   :  { %v1205_v0 = vpop.f32.mrf.mxu3 }
 0x240   :  { %v1617_v5 = vpop.eup %1616  ;;  %v1206_v60 = vadd.f32 %v1205_v0, %v1192_v13 }
 0x241   :  { %1210 = vst [vmem:[#allocation13] sm:$0xff] %v1617_v5 }
 0x242   :  { %1618 = vtanh.f32 %v1206_v60 }
 0x248   :  { %v1619_v41 = vpop.eup %1618 }
 0x249   :  { %1211 = vst [vmem:[#allocation13 + $0x8] sm:$0xff] %v1619_v41 }
 0x24a   :  { %1224 = dma.vmem_to_hbm [thread:$0]  %s1217_s16, 256, %s1219_s19, [#allocation7], %s1757_s4, %s1757_s4, %s1758_s20  }
 0x24b   :  { %1746 = dma.done.wait [#allocation7], 256  }
 0x24c   :  { %1747 = vsyncadd [#allocation7], 4294967040 }
 0x24d   :  { %1229 = vsyncpa [#allocation6], 1 }
 0x24e   :  { %1230 = vsyncpa [#allocation9], 1 }
 0x24f   :  { %1231 = vsyncpa [#allocation12], 1 }
 0x250   :  { %1232 = vsyncpa [#allocation7], 1 }

</bundles_post_ra>
